<compile_context>
chip_gen: v7x
topology: tpu7x:2x2x1
jax: 0.10.0
libtpu: 0.0.40
codegen_flags: <defaults>
</compile_context>

<pallas_src>
import functools

import jax
import jax.numpy as jnp
import numpy as np
from jax.experimental import pallas as pl
from jax.experimental.pallas import tpu as pltpu

_H = _W = 32            # conv1 input spatial size
_HW = _H * _W           # 1024 flat spatial positions per image (8 * 128)
B_TILE = 8              # images processed per grid step


# ---------------------------------------------------------------------------
# one-time probe: does pltpu.roll match jnp.roll (result[i] = x[i - shift])?
# ---------------------------------------------------------------------------
def _roll_matches_jnp():
    def k(x_ref, o_ref):
        o_ref[...] = pltpu.roll(x_ref[...], 1, axis=1)

    x = jnp.tile(jnp.arange(128, dtype=jnp.float32)[None, :], (8, 1))
    y = pl.pallas_call(
        k, out_shape=jax.ShapeDtypeStruct((8, 128), jnp.float32))(x)
    return bool(np.asarray(y)[0, 0] > 64.0)


# ---------------------------------------------------------------------------
# fused LeNet kernel (B_TILE images per grid step)
# ---------------------------------------------------------------------------
def _lenet_kernel(x_ref, s_ref, rep_ref, dmask_ref, gsel_ref,
                  w1_ref, b1_ref, w2_ref, b2_ref,
                  fw1_ref, fb1_ref, fw2_ref, fb2_ref, fw3_ref, fb3_ref,
                  o_ref, xs1_ref, xs2_ref, *, b_tile, roll_like_jnp):
    f32 = jnp.float32
    L = b_tile * _HW

    def shifted(v, s):
        # u with u[:, p] == v[:, p + s]; wrapped lanes are don't-care because
        # every valid output lane keeps p + s inside its own image's segment.
        if s == 0:
            return v
        amt = (L - s) if roll_like_jnp else s
        return pltpu.roll(v, amt, axis=1)

    x = x_ref[...]                                            # (3, L)

    # ---- conv1: stack the 25 shifted copies in VMEM, one K=75 matmul -------
    for i in range(5):
        xr = shifted(x, i * _W)                               # row roll
        for j in range(5):
            xs1_ref[pl.ds(3 * (i * 5 + j), 3), :] = shifted(xr, j)
    y1 = jnp.dot(w1_ref[...], xs1_ref[...],
                 preferred_element_type=f32) + b1_ref[...]
    y1 = jnp.maximum(y1, 0.0)                                 # (6, L)
    # valid per image at p = 32*oh + ow, oh,ow < 28

    # ---- maxpool 2x2 / 2 (stays embedded in the 32x32 grid, stride 2) ------
    z1 = jnp.maximum(jnp.maximum(y1, shifted(y1, 1)),
                     jnp.maximum(shifted(y1, _W), shifted(y1, _W + 1)))
    # valid at p = 64*ph + 2*pw, ph,pw < 14

    # ---- conv2: stride-2 shifts, stacked, one K=150 matmul ------------------
    for i in range(5):
        zr = shifted(z1, 2 * i * _W)
        for j in range(5):
            xs2_ref[pl.ds(6 * (i * 5 + j), 6), :] = shifted(zr, 2 * j)
    y2 = jnp.dot(w2_ref[...], xs2_ref[...],
                 preferred_element_type=f32) + b2_ref[...]
    y2 = jnp.maximum(y2, 0.0)                                 # (16, L)
    # valid at p = 64*oh + 2*ow, oh,ow < 10

    # ---- maxpool 2x2 / 2 on the stride-2 grid -------------------------------
    z2 = jnp.maximum(jnp.maximum(y2, shifted(y2, 2)),
                     jnp.maximum(shifted(y2, 2 * _W), shifted(y2, 2 * _W + 2)))
    # valid at p = 128*ph + 4*pw, ph,pw < 5

    # ---- per-image compaction: (16,1024) @ (1024,25) -> (16,25) ------------
    parts = [jnp.dot(z2[:, b * _HW:(b + 1) * _HW], s_ref[...],
                     preferred_element_type=f32) for b in range(b_tile)]
    zc = jnp.concatenate(parts, axis=0)                       # (16*B, 25)

    # ---- lane->sublane flatten via 0/1 matmuls (replicate, mask, select) ---
    # rep[r, c*25+q] = zc[r, q];  mask keeps c == r%16;  gsel sums each image's
    # 16 channel rows -> feat[b, c*25+q] = pooled[b, c, ph, pw]  (torch order).
    rep = jnp.dot(zc, rep_ref[...], preferred_element_type=f32)   # (16B, 400)
    feat = jnp.dot(gsel_ref[...], rep * dmask_ref[...],
                   preferred_element_type=f32)                     # (B, 400)

    # ---- fc1 / fc2 / fc3 (batch on sublanes, lane-dense padded logits) -----
    h = jnp.maximum(jnp.dot(feat, fw1_ref[...],
                            preferred_element_type=f32) + fb1_ref[...], 0.0)
    h = jnp.maximum(jnp.dot(h, fw2_ref[...],
                            preferred_element_type=f32) + fb2_ref[...], 0.0)
    o_ref[...] = jnp.dot(h, fw3_ref[...],
                         preferred_element_type=f32) + fb3_ref[...]   # (B,128)


# ---------------------------------------------------------------------------
# host-side wrappers
# ---------------------------------------------------------------------------
_PREP_KEYS = ("S", "REP", "DMASK", "GSEL", "w1", "b1", "w2", "b2",
              "fw1", "fb1", "fw2", "fb2", "fw3", "fb3")


def prepare_params(p, b_tile=B_TILE):
    """One-time re-layout of PyTorch-style weights into kernel-friendly arrays."""
    # compaction: picks the 25 valid pooled lanes (128*ph + 4*pw) per channel
    S = np.zeros((_HW, 25), np.float32)
    for q in range(25):
        S[128 * (q // 5) + 4 * (q % 5), q] = 1.0
    # lane replication: rep[q, j] = 1 iff j % 25 == q
    REP = np.zeros((25, 400), np.float32)
    for j in range(400):
        REP[j % 25, j] = 1.0
    # block-diagonal mask: row r (channel c = r%16) keeps lanes [25c, 25c+25)
    DMASK = np.zeros((b_tile * 16, 400), np.float32)
    for r in range(b_tile * 16):
        c = r % 16
        DMASK[r, 25 * c:25 * c + 25] = 1.0
    # group-select: sums the 16 channel rows of each image
    GSEL = np.zeros((b_tile, b_tile * 16), np.float32)
    for b in range(b_tile):
        GSEL[b, 16 * b:16 * (b + 1)] = 1.0
    # fc3 padded to 128 output lanes for an unmasked, lane-dense store
    fw3 = np.zeros((84, 128), np.float32)
    fw3[:, :10] = np.asarray(p["fc3_w"], np.float32)
    fb3 = np.zeros((1, 128), np.float32)
    fb3[0, :10] = np.asarray(p["fc3_b"], np.float32)
    return {
        "S": jnp.asarray(S), "REP": jnp.asarray(REP),
        "DMASK": jnp.asarray(DMASK), "GSEL": jnp.asarray(GSEL),
        # w1[oc, 3*(i*5+j) + c] = conv1_w[oc, c, i, j]
        "w1": jnp.transpose(p["conv1_w"], (0, 2, 3, 1)).reshape(6, 75),
        "b1": p["conv1_b"].reshape(6, 1),
        # w2[oc, 6*(i*5+j) + c] = conv2_w[oc, c, i, j]
        "w2": jnp.transpose(p["conv2_w"], (0, 2, 3, 1)).reshape(16, 150),
        "b2": p["conv2_b"].reshape(16, 1),
        "fw1": p["fc1_w"], "fb1": p["fc1_b"].reshape(1, 120),
        "fw2": p["fc2_w"], "fb2": p["fc2_b"].reshape(1, 84),
        "fw3": jnp.asarray(fw3), "fb3": jnp.asarray(fb3),
    }


def net_forward(x, prep, *, b_tile=B_TILE, roll_like_jnp=True):
    n = x.shape[0]
    n_pad = -(-n // b_tile) * b_tile
    if n_pad != n:
        x = jnp.concatenate(
            [x, jnp.zeros((n_pad - n,) + x.shape[1:], x.dtype)], axis=0)
    L = b_tile * _HW
    # lanes = image-major flattened 32x32 grid: x2[c, b*1024 + p] = x[b, c, p]
    x2 = jnp.transpose(x.reshape(n_pad, 3, _HW), (1, 0, 2)).reshape(
        3, n_pad * _HW)

    consts = [prep[k] for k in _PREP_KEYS]
    in_specs = [pl.BlockSpec((3, L), lambda s: (0, s))]
    for a in consts:
        # constant index maps: weight blocks are DMA'd once and stay resident
        in_specs.append(pl.BlockSpec(a.shape, lambda s: (0, 0)))

    flops_per_img = 2 * (6 * 75 * _HW + 16 * 150 * _HW + 16 * _HW * 25
                         + 16 * 25 * 400 + 400 * 120 + 120 * 84 + 84 * 128)
    cost = pl.CostEstimate(flops=flops_per_img * n_pad, transcendentals=0,
                           bytes_accessed=(3 * _HW + 128) * 4 * n_pad)

    out = pl.pallas_call(
        functools.partial(_lenet_kernel, b_tile=b_tile,
                          roll_like_jnp=roll_like_jnp),
        grid=(n_pad // b_tile,),
        out_shape=jax.ShapeDtypeStruct((n_pad, 128), jnp.float32),
        in_specs=in_specs,
        out_specs=pl.BlockSpec((b_tile, 128), lambda s: (s, 0)),
        scratch_shapes=[pltpu.VMEM((75, L), jnp.float32),    # conv1 K-stack
                        pltpu.VMEM((150, L), jnp.float32)],  # conv2 K-stack
        compiler_params=pltpu.CompilerParams(
            dimension_semantics=("parallel",),
            vmem_limit_bytes=32 * 1024 * 1024),
        cost_estimate=cost,
    )(x2, *consts)
    return out[:n, :10]


# ---------------------------------------------------------------------------
# pure-JAX reference + params
# ---------------------------------------------------------------------------
def net_forward_ref(x, params):
    def conv(x, w, b):
        y = jax.lax.conv_general_dilated(
            x, w, window_strides=(1, 1), padding="VALID",
            dimension_numbers=("NCHW", "OIHW", "NCHW"))
        return jax.nn.relu(y + b[None, :, None, None])

    def pool(x):
        n, c, h, w = x.shape
        return jnp.max(x.reshape(n, c, h // 2, 2, w // 2, 2), axis=(3, 5))

    x = pool(conv(x, params["conv1_w"], params["conv1_b"]))
    x = pool(conv(x, params["conv2_w"], params["conv2_b"]))
    x = x.reshape(x.shape[0], -1)
    x = jax.nn.relu(x @ params["fc1_w"] + params["fc1_b"])
    x = jax.nn.relu(x @ params["fc2_w"] + params["fc2_b"])
    return x @ params["fc3_w"] + params["fc3_b"]


def init_params(key):
    ks = jax.random.split(key, 10)
    scale = 0.1
    return {
        "conv1_w": scale * jax.random.normal(ks[0], (6, 3, 5, 5), jnp.float32),
        "conv1_b": scale * jax.random.normal(ks[1], (6,), jnp.float32),
        "conv2_w": scale * jax.random.normal(ks[2], (16, 6, 5, 5), jnp.float32),
        "conv2_b": scale * jax.random.normal(ks[3], (16,), jnp.float32),
        "fc1_w": scale * jax.random.normal(ks[4], (16 * 5 * 5, 120), jnp.float32),
        "fc1_b": scale * jax.random.normal(ks[5], (120,), jnp.float32),
        "fc2_w": scale * jax.random.normal(ks[6], (120, 84), jnp.float32),
        "fc2_b": scale * jax.random.normal(ks[7], (84,), jnp.float32),
        "fc3_w": scale * jax.random.normal(ks[8], (84, 10), jnp.float32),
        "fc3_b": scale * jax.random.normal(ks[9], (10,), jnp.float32),
    }


if __name__ == "__main__":
    key = jax.random.PRNGKey(0)
    kx, kp = jax.random.split(key)
    params = init_params(kp)
    prep = prepare_params(params, B_TILE)

    # LeNet on 32x32 RGB: 32 -> conv 28 -> pool 14 -> conv 10 -> pool 5.
    # n = 16 with B_TILE = 8 gives 2 grid steps (both v7x TensorCores busy).
    x = jax.random.normal(kx, (16, 3, 32, 32), jnp.float32)

    roll_flag = _roll_matches_jnp()
    fwd = jax.jit(functools.partial(net_forward, b_tile=B_TILE,
                                    roll_like_jnp=roll_flag))

    out = jax.block_until_ready(fwd(x, prep))
    assert out.shape == (16, 10), out.shape

    ref = jax.block_until_ready(net_forward_ref(x, params))
    np.testing.assert_allclose(np.asarray(out), np.asarray(ref),
                               rtol=1e-3, atol=1e-3)

    print("KERNEL_OK")
</pallas_src>

<mosaic_0001>
module attributes {stable_mosaic.version = 11 : i64} {
  func.func @k(%arg0: memref<8x128xf32, #tpu.memory_space<vmem>>, %arg1: memref<8x128xf32, #tpu.memory_space<vmem>>) attributes {dimension_semantics = [], scalar_prefetch = 0 : i64, scratch_operands = 0 : i64, tpu.core_type = #tpu.core_type<tc>} {
    %c0 = arith.constant 0 : index
    %c0_0 = arith.constant 0 : index
    %0 = vector.load %arg0[%c0, %c0_0] : memref<8x128xf32, #tpu.memory_space<vmem>>, vector<8x128xf32>
    %c1_i32 = arith.constant 1 : i32
    %1 = tpu.dynamic_rotate %0 by %c1_i32 dim 1 : vector<8x128xf32>, i32 -> vector<8x128xf32>
    %c0_1 = arith.constant 0 : index
    %c0_2 = arith.constant 0 : index
    %2 = vector.load %arg1[%c0_1, %c0_2] : memref<8x128xf32, #tpu.memory_space<vmem>>, vector<8x128xf32>
    tpu.vector_store %arg1[%c0_1, %c0_2], %1 {strides = array<i32>} : memref<8x128xf32, #tpu.memory_space<vmem>>, vector<8x128xf32>,
    return
  }
}

</mosaic_0001>

<bundles_post_ra>
// kernel: tpu_custom_call.1
= control target key start
LH: loop header
LB: loop body
LE: loop exit
PB: predicated region body
PF: predicated region fallthrough
CT: control target
= control target key end

     0   :  { %6 = vsyncpa [#allocation3], 0  ;;  %s128_s0 = inlined_call_operand.hbm [shape: f32[8,128], index: 0, kind: input, shape index: {}]   ;;  %s129_s1 = inlined_call_operand.hbm [shape: f32[8,128], index: 1, kind: output, shape index: {}]  }
   0x1   :  { %7 = vsyncpa [#allocation4], 0  ;;  %s91_s6 = smov [#allocation2]   ;;  %s43_s10 = scalar_lea.hbm %s128_s0, 128 }
   0x2   :  { %s14_s7 = sshll.u32 %s91_s6, 4  ;;  %p44_p0 = scmp.ne.s32.totalorder %s128_s0, %s43_s10  ;;  %s15_s7 = int_to_ptr.vmem [resolvable:$true] %s14_s7 }
   0x3   :  { %p47_p1 = scmp.lt.u32.totalorder %s43_s10, %s128_s0 }
   0x5   :  { %p49_p2 = pnand %p47_p1, %p44_p0 }
   0x7   :  { %52 = shalt.err (!%p49_p2)
}
   0x8   :  { %s53_s15 = scalar_lea.vmem %s15_s7, 128  ;;  %p58_p4 = scmp.lt.s32.totalorder %s15_s7, %s15_s7 }
   0x9   :  { %p54_p3 = scmp.ne.s32.totalorder %s15_s7, %s53_s15  ;;  %p59_p5 = scmp.lt.s32.totalorder %s53_s15, %s53_s15 }
   0xb   :  { %p60_p6 = por %p59_p5, %p58_p4 }
   0xd   :  { %p61_p7 = pnand %p60_p6, %p54_p3 }
   0xf   :  { %64 = shalt.err (!%p61_p7)
}
  0x10   :  { %17 = dma.hbm_to_vmem [thread:$0]  %s128_s0, 128, %s15_s7, [#allocation3]  }
  0x11   :  { %87 = dma.done.wait [#allocation3], 128  }
  0x12   :  { %88 = vsyncadd [#allocation3], 4294967168  ;;  %v21_v0 = vld [vmem:[#allocation2] sm:$0xff]  ;;  %s92_s18 = smov 1   ;;  %s93_s19 = smov [#allocation5]  }
  0x13   :  { %22 = vrot.lane.b32.xlu0 %v21_v0, %s92_s18  ;;  %s31_s20 = sshll.u32 %s93_s19, 4  ;;  %s32_s20 = int_to_ptr.vmem [resolvable:$true] %s31_s20 }
  0x14   :  { %s65_s21 = scalar_lea.vmem %s32_s20, 128  ;;  %p70_p9 = scmp.lt.s32.totalorder %s32_s20, %s32_s20 }
  0x15   :  { %p66_p8 = scmp.ne.s32.totalorder %s32_s20, %s65_s21  ;;  %p71_p10 = scmp.lt.s32.totalorder %s65_s21, %s65_s21 }
  0x17   :  { %p72_p11 = por %p71_p10, %p70_p9 }
  0x19   :  { %p73_p12 = pnand %p72_p11, %p66_p8 }
  0x85   :  { %v23_v1 = vpop.permute.xlu0 %22 }
  0x86   :  { %24 = vst [vmem:[#allocation5] sm:$0xff] %v23_v1 }
  0x87   :  { %76 = shalt.err (!%p73_p12)
}
  0x88   :  { %s77_s0 = scalar_lea.hbm %s129_s1, 128 }
  0x89   :  { %p78_p13 = scmp.ne.s32.totalorder %s129_s1, %s77_s0  ;;  %p81_p0 = scmp.lt.u32.totalorder %s77_s0, %s129_s1 }
  0x8b   :  { %p83_p1 = pnand %p81_p0, %p78_p13 }
  0x8d   :  { %86 = shalt.err (!%p83_p1)
}
  0x8e   :  { %34 = dma.vmem_to_hbm [thread:$0]  %s32_s20, 128, %s129_s1, [#allocation4]  }
  0x8f   :  { %89 = dma.done.wait [#allocation4], 128  }
  0x90   :  { %90 = vsyncadd [#allocation4], 4294967168 }
  0x91   :  { %38 = vsyncpa [#allocation3], 1 }
  0x92   :  { %39 = vsyncpa [#allocation4], 1 }

</bundles_post_ra>
